<compile_context>
chip_gen: v6e
topology: v6e:2x2x1
jax: 0.10.0
libtpu: 0.0.40
codegen_flags: <defaults>
</compile_context>

<pallas_src>
import jax
import jax.numpy as jnp
from jax.experimental import pallas as pl
from jax.experimental.pallas import tpu as pltpu

H = 200          # logical number of classes / hidden width (fixed by the module)
HP = 256         # lane-dense padded width (multiple of 128)


def _round_up(v, m):
    return ((v + m - 1) // m) * m


def mlp_kernel(x_ref, table_ref, pgx_ref):
    """x_ref: (TM, K) int32; table_ref: (HP, HP) resident; pgx_ref: (TM, OL) f32."""
    TM, K = x_ref.shape
    hp = table_ref.shape[-1]
    OL = pgx_ref.shape[-1]
    wdt = table_ref.dtype

    # ---- one-hot of x[:, 0] via lane-iota compare (exact in bf16: 0/1) ----
    lane = jax.lax.broadcasted_iota(jnp.int32, (TM, hp), dimension=1)
    x1hot = (lane == x_ref[:, 0:1]).astype(jnp.float32)          # (TM, HP)

    # ---- row fetch on the MXU: probs[b, :] = table[x[b, 0], :] -----------
    probs = jnp.dot(x1hot.astype(wdt), table_ref[...],
                    preferred_element_type=jnp.float32)          # (TM, HP) f32

    # ---- gather along dim 1, folded into a lane-dense (TM, OL) tile ------
    #   out[b, j] = probs[b, x[b, j+1]]
    out_lane = jax.lax.broadcasted_iota(jnp.int32, (TM, OL), dimension=1)
    acc = jnp.zeros((TM, OL), jnp.float32)
    for j in range(K - 1):
        idx = x_ref[:, j + 1:j + 2]                              # (TM, 1)
        col = jnp.sum(jnp.where(lane == idx, probs, 0.0),
                      axis=-1, keepdims=True)                    # (TM, 1)
        acc = jnp.where(out_lane == j, col, acc)                 # drop into lane j
    pgx_ref[...] = acc                                           # one unmasked store


def mlp_forward(x, theta, w1, b1, w2, b2, *, block_b=1024,
                weights_dtype=jnp.bfloat16,
                vmem_limit_bytes=48 * 1024 * 1024):
    """x: [B, K] int32; theta: [200]; w1/w2: [200, 200]; b1/b2: [200].

    Returns (px1 [200] f32, px2Gx1 [B, K-1] f32), matching the torch module.
    """
    B, K = x.shape
    x = x.astype(jnp.int32)
    hi = jax.lax.Precision.HIGHEST

    # ---- x-independent pieces, hoisted out of the kernel (plain JAX) ------
    px1 = jax.nn.softmax(theta.astype(jnp.float32))

    # Precompute the 200-row conditional probability table:
    #   row i = softmax(relu(e_i @ W1.T + b1) @ W2.T + b2)
    #         = softmax(relu(W1.T + b1)[i] @ W2.T + b2)
    h = jnp.maximum(w1.T.astype(jnp.float32) + b1.astype(jnp.float32)[None, :], 0.0)
    logits = jnp.dot(h, w2.T.astype(jnp.float32), precision=hi) \
        + b2.astype(jnp.float32)[None, :]
    table = jax.nn.softmax(logits, axis=-1)                      # (H, H) f32
    table_p = jnp.zeros((HP, HP), weights_dtype).at[:H, :H].set(
        table.astype(weights_dtype))

    # ---- batch tiling ------------------------------------------------------
    OL = max(128, _round_up(max(K - 1, 1), 128))   # lane-dense output width
    tm = min(block_b, _round_up(B, 8))
    if B > 8:                                      # give megacore >= 2 tiles
        tm = min(tm, _round_up(-(-B // 2), 8))
    tm = max(tm, 8)
    padded_b = _round_up(B, tm)
    nb = padded_b // tm
    if padded_b != B:
        x = jnp.pad(x, ((0, padded_b - B), (0, 0)))   # padded rows index 0; sliced off

    pgx = pl.pallas_call(
        mlp_kernel,
        out_shape=jax.ShapeDtypeStruct((padded_b, OL), jnp.float32),
        grid_spec=pltpu.PrefetchScalarGridSpec(
            num_scalar_prefetch=0,
            grid=(nb,),
            in_specs=[
                pl.BlockSpec((tm, K), lambda i: (i, 0)),     # x: per batch tile
                pl.BlockSpec((HP, HP), lambda i: (0, 0)),    # table: VMEM-resident
            ],
            out_specs=pl.BlockSpec((tm, OL), lambda i: (i, 0)),
        ),
        compiler_params=pltpu.CompilerParams(
            dimension_semantics=("parallel",),
            vmem_limit_bytes=vmem_limit_bytes),
    )(x, table_p)

    return px1, pgx[:B, :K - 1]


if __name__ == "__main__":
    B, K = 8, 4
    key = jax.random.PRNGKey(0)
    kx, k1, k2, k3, k4 = jax.random.split(key, 5)

    # inputs: first column = class index, remaining columns = gather indices
    x = jax.random.randint(kx, (B, K), 0, H, dtype=jnp.int32)

    # parameters: theta zeros like the module; Linear layers use
    # PyTorch-style uniform(-1/sqrt(in), 1/sqrt(in)).
    theta = jnp.zeros((H,), jnp.float32)
    bound = 1.0 / (H ** 0.5)
    w1 = jax.random.uniform(k1, (H, H), jnp.float32, -bound, bound)
    b1 = jax.random.uniform(k2, (H,), jnp.float32, -bound, bound)
    w2 = jax.random.uniform(k3, (H, H), jnp.float32, -bound, bound)
    b2 = jax.random.uniform(k4, (H,), jnp.float32, -bound, bound)

    # pure-JAX reference following the torch module structure
    hi = jax.lax.Precision.HIGHEST
    x1hot = jax.nn.one_hot(x[:, 0], H, dtype=jnp.float32)
    px1_ref = jnp.exp(theta) / jnp.sum(jnp.exp(theta))
    h_ref = jnp.maximum(jnp.dot(x1hot, w1.T, precision=hi) + b1, 0.0)
    probs_ref = jax.nn.softmax(jnp.dot(h_ref, w2.T, precision=hi) + b2, axis=1)
    pgx_ref = jnp.take_along_axis(probs_ref, x[:, 1:], axis=1)

    # production path: bf16 table on the MXU (one-hot LHS cast is exact)
    px1, pgx = mlp_forward(x, theta, w1, b1, w2, b2)
    jax.block_until_ready((px1, pgx))
    assert jnp.allclose(px1, px1_ref, atol=1e-5), "px1 mismatch (bf16 path)"
    assert jnp.allclose(pgx, pgx_ref, atol=1e-2), "px2Gx1 mismatch (bf16 path)"

    # strict reference check with the f32 table path
    px1_f, pgx_f = mlp_forward(x, theta, w1, b1, w2, b2,
                               weights_dtype=jnp.float32)
    jax.block_until_ready((px1_f, pgx_f))
    assert jnp.allclose(px1_f, px1_ref, atol=1e-5), "px1 mismatch (f32 path)"
    assert jnp.allclose(pgx_f, pgx_ref, atol=1e-5), "px2Gx1 mismatch (f32 path)"

    print("KERNEL_OK")
</pallas_src>

<mosaic_0001>
module attributes {stable_mosaic.version = 11 : i64} {
  func.func @mlp_kernel(%arg0: i32, %arg1: memref<8x4xi32, #tpu.memory_space<vmem>>, %arg2: memref<256x256xbf16, #tpu.memory_space<vmem>>, %arg3: memref<8x128xf32, #tpu.memory_space<vmem>>) attributes {dimension_semantics = [#tpu.dimension_semantics<parallel>], iteration_bounds = array<i64: 1>, scalar_prefetch = 0 : i64, scratch_operands = 0 : i64, tpu.core_type = #tpu.core_type<tc>, window_params = [{transform_indices = @transform_0, window_bounds = array<i64: 8, 4>}, {pipeline_mode = #tpu.pipeline_mode<synchronous>, transform_indices = @transform_1, window_bounds = array<i64: 256, 256>}, {transform_indices = @transform_2, window_bounds = array<i64: 8, 128>}]} {
    %0 = tpu.iota {dimensions = array<i32: 1>} : vector<8x256xi32>
    %c0 = arith.constant 0 : index
    %c0_0 = arith.constant 0 : index
    %1 = vector.load %arg1[%c0, %c0_0] : memref<8x4xi32, #tpu.memory_space<vmem>>, vector<8x1xi32>
    %2 = vector.broadcast %1 : vector<8x1xi32> to vector<8x256xi32>
    %3 = arith.cmpi eq, %0, %2 : vector<8x256xi32>
    %4 = arith.extui %3 : vector<8x256xi1> to vector<8x256xi32>
    %5 = arith.sitofp %4 : vector<8x256xi32> to vector<8x256xf32>
    %6 = arith.truncf %5 : vector<8x256xf32> to vector<8x256xbf16>
    %c0_1 = arith.constant 0 : index
    %c0_2 = arith.constant 0 : index
    %7 = vector.load %arg2[%c0_1, %c0_2] : memref<256x256xbf16, #tpu.memory_space<vmem>>, vector<256x256xbf16>
    %cst = arith.constant dense<0.000000e+00> : vector<8x256xf32>
    %8 = tpu.matmul %6, %7, %cst {dimension_numbers = #tpu.dot_dimension_numbers<[1], [0], [0], [1], [0, 0, 1, 1], [], []>} : vector<8x256xbf16>, vector<256x256xbf16>, vector<8x256xf32> -> vector<8x256xf32>
    %9 = tpu.iota {dimensions = array<i32: 1>} : vector<8x128xi32>
    %cst_3 = arith.constant 0.000000e+00 : f32
    %10 = vector.broadcast %cst_3 : f32 to vector<8x128xf32>
    %c0_4 = arith.constant 0 : index
    %c1 = arith.constant 1 : index
    %11 = vector.load %arg1[%c0_4, %c1] : memref<8x4xi32, #tpu.memory_space<vmem>>, vector<8x1xi32>
    %12 = vector.broadcast %11 : vector<8x1xi32> to vector<8x256xi32>
    %13 = arith.cmpi eq, %0, %12 : vector<8x256xi32>
    %cst_5 = arith.constant 0.000000e+00 : f32
    %14 = vector.broadcast %cst_5 : f32 to vector<8x256xf32>
    %15 = arith.select %13, %8, %14 : vector<8x256xi1>, vector<8x256xf32>
    %cst_6 = arith.constant dense<0.000000e+00> : vector<8xf32>
    %16 = vector.multi_reduction <add>, %15, %cst_6 [1] : vector<8x256xf32> to vector<8xf32>
    %17 = vector.shape_cast %16 : vector<8xf32> to vector<8x1xf32>
    %c0_i32 = arith.constant 0 : i32
    %18 = vector.broadcast %c0_i32 : i32 to vector<8x128xi32>
    %19 = arith.cmpi eq, %9, %18 : vector<8x128xi32>
    %20 = vector.shape_cast %17 : vector<8x1xf32> to vector<8x1xf32>
    %21 = vector.broadcast %20 : vector<8x1xf32> to vector<8x128xf32>
    %22 = arith.select %19, %21, %10 : vector<8x128xi1>, vector<8x128xf32>
    %c0_7 = arith.constant 0 : index
    %c2 = arith.constant 2 : index
    %23 = vector.load %arg1[%c0_7, %c2] : memref<8x4xi32, #tpu.memory_space<vmem>>, vector<8x1xi32>
    %24 = vector.broadcast %23 : vector<8x1xi32> to vector<8x256xi32>
    %25 = arith.cmpi eq, %0, %24 : vector<8x256xi32>
    %cst_8 = arith.constant 0.000000e+00 : f32
    %26 = vector.broadcast %cst_8 : f32 to vector<8x256xf32>
    %27 = arith.select %25, %8, %26 : vector<8x256xi1>, vector<8x256xf32>
    %cst_9 = arith.constant dense<0.000000e+00> : vector<8xf32>
    %28 = vector.multi_reduction <add>, %27, %cst_9 [1] : vector<8x256xf32> to vector<8xf32>
    %29 = vector.shape_cast %28 : vector<8xf32> to vector<8x1xf32>
    %c1_i32 = arith.constant 1 : i32
    %30 = vector.broadcast %c1_i32 : i32 to vector<8x128xi32>
    %31 = arith.cmpi eq, %9, %30 : vector<8x128xi32>
    %32 = vector.shape_cast %29 : vector<8x1xf32> to vector<8x1xf32>
    %33 = vector.broadcast %32 : vector<8x1xf32> to vector<8x128xf32>
    %34 = arith.select %31, %33, %22 : vector<8x128xi1>, vector<8x128xf32>
    %c0_10 = arith.constant 0 : index
    %c3 = arith.constant 3 : index
    %35 = vector.load %arg1[%c0_10, %c3] : memref<8x4xi32, #tpu.memory_space<vmem>>, vector<8x1xi32>
    %36 = vector.broadcast %35 : vector<8x1xi32> to vector<8x256xi32>
    %37 = arith.cmpi eq, %0, %36 : vector<8x256xi32>
    %cst_11 = arith.constant 0.000000e+00 : f32
    %38 = vector.broadcast %cst_11 : f32 to vector<8x256xf32>
    %39 = arith.select %37, %8, %38 : vector<8x256xi1>, vector<8x256xf32>
    %cst_12 = arith.constant dense<0.000000e+00> : vector<8xf32>
    %40 = vector.multi_reduction <add>, %39, %cst_12 [1] : vector<8x256xf32> to vector<8xf32>
    %41 = vector.shape_cast %40 : vector<8xf32> to vector<8x1xf32>
    %c2_i32 = arith.constant 2 : i32
    %42 = vector.broadcast %c2_i32 : i32 to vector<8x128xi32>
    %43 = arith.cmpi eq, %9, %42 : vector<8x128xi32>
    %44 = vector.shape_cast %41 : vector<8x1xf32> to vector<8x1xf32>
    %45 = vector.broadcast %44 : vector<8x1xf32> to vector<8x128xf32>
    %46 = arith.select %43, %45, %34 : vector<8x128xi1>, vector<8x128xf32>
    %c0_13 = arith.constant 0 : index
    %c0_14 = arith.constant 0 : index
    %47 = vector.load %arg3[%c0_13, %c0_14] : memref<8x128xf32, #tpu.memory_space<vmem>>, vector<8x128xf32>
    tpu.vector_store %arg3[%c0_13, %c0_14], %46 {strides = array<i32>} : memref<8x128xf32, #tpu.memory_space<vmem>>, vector<8x128xf32>,
    return
  }
  func.func @transform_0(%arg0: i32) -> (i32, i32) {
    %c0_i32 = arith.constant 0 : i32
    %c0_i32_0 = arith.constant 0 : i32
    return %arg0, %c0_i32 : i32, i32
  }
  func.func @transform_1(%arg0: i32) -> (i32, i32) {
    %c0_i32 = arith.constant 0 : i32
    %c0_i32_0 = arith.constant 0 : i32
    %c0_i32_1 = arith.constant 0 : i32
    return %c0_i32, %c0_i32_0 : i32, i32
  }
  func.func @transform_2(%arg0: i32) -> (i32, i32) {
    %c0_i32 = arith.constant 0 : i32
    %c0_i32_0 = arith.constant 0 : i32
    return %arg0, %c0_i32 : i32, i32
  }
}

</mosaic_0001>

<bundles_post_ra>
// kernel: tpu_custom_call.1
= control target key start
LH: loop header
LB: loop body
LE: loop exit
PB: predicated region body
PF: predicated region fallthrough
CT: control target
= control target key end

     0   :  { %7 = vsyncpa [#allocation3], 0  ;;  %s503_s0 = inlined_call_operand.vmem [shape: s32[8,4], index: 0, kind: input, shape index: {}]   ;;  %s504_s1 = inlined_call_operand.hbm [shape: bf16[256,256], index: 1, kind: input, shape index: {}]   ;;  %s505_s2 = inlined_call_operand.hbm [shape: f32[8,128], index: 2, kind: output, shape index: {}]  }
   0x1   :  { %8 = vsyncpa [#allocation4], 0  ;;  %s470_s9 = smov [#allocation2]  }
   0x2   :  { %s16_s10 = sshll.u32 %s470_s9, 4  ;;  %s17_s10 = int_to_ptr.vmem [resolvable:$true] %s16_s10 }
   0x3   :  { %s434_s11 = scalar_lea.vmem %s17_s10, 4096  ;;  %p439_p1 = scmp.lt.s32.totalorder %s17_s10, %s17_s10 }
   0x4   :  { %p435_p0 = scmp.ne.s32.totalorder %s17_s10, %s434_s11  ;;  %p440_p2 = scmp.lt.s32.totalorder %s434_s11, %s434_s11 }
   0x6   :  { %p441_p3 = por %p440_p2, %p439_p1 }
   0x8   :  { %p442_p4 = pnand %p441_p3, %p435_p0 }
   0xa   :  { %445 = shalt.err (!%p442_p4)
}
   0xb   :  { %s471_s12 = smov 128   ;;  %s472_s13 = smov 8  }
   0xc   :  { %22 = dma.hbm_to_vmem [thread:$0]  %s504_s1, 4096, %s17_s10, [#allocation3], %s471_s12, %s471_s12, %s472_s13  }
   0xd   :  { %466 = dma.done.wait [#allocation3], 4096  }
   0xe   :  { %467 = vsyncadd [#allocation3], 4294963200  ;;  %v473_v0 = vmov 0   ;;  %v29_v1 = vld [vmem:[%s503_s0] sm:$0xff]  ;;  %v378_v2 = vld [vmem:[#allocation2 + $0x74] ss:$8 sps:$4 sm:$0xff]   ;;  %v26_v37 = vlaneseq }
   0xf   :  { %373 = vset.pattern.permute.xlu0 %v473_v0  ;;  %v380_v3 = vld [vmem:[#allocation2 + $0x70] ss:$8 sps:$4 sm:$0xff]   ;;  %v381_v4 = vld [vmem:[#allocation2 + $0x64] ss:$8 sps:$4 sm:$0xff]   ;;  %v474_v5 = vmov 2   ;;  %233 = vmatprep.subr.bf16.mxu0 %v378_v2  ;;  %v475_v8 = vmov 1  }
  0x10   :  { %31 = vperm.xlu0 %373, %v29_v1   ;;  %375 = vset.pattern.permute.xlu1 %v474_v5  ;;  %v383_v6 = vld [vmem:[#allocation2 + $0x60] ss:$8 sps:$4 sm:$0xff]   ;;  %v384_v7 = vld [vmem:[#allocation2 + $0x54] ss:$8 sps:$4 sm:$0xff]   ;;  %v476_v9 = vmov 3   ;;  %v27_v38 = vand.u32 127, %v26_v37 }
  0x11   :  { %287 = vperm.xlu1 %375, %v29_v1   ;;  %234 = vmatpush1.bf16.msra.mxu0 %v380_v3  ;;  %v386_v10 = vld [vmem:[#allocation2 + $0x50] ss:$8 sps:$4 sm:$0xff]   ;;  %v387_v11 = vld [vmem:[#allocation2 + $0x44] ss:$8 sps:$4 sm:$0xff]   ;;  %v389_v12 = vld [vmem:[#allocation2 + $0x40] ss:$8 sps:$4 sm:$0xff]  }
  0x12   :  { %235 = vmatprep.subr.bf16.mxu0 %v381_v4  ;;  %v390_v13 = vld [vmem:[#allocation2 + $0x34] ss:$8 sps:$4 sm:$0xff]   ;;  %v392_v14 = vld [vmem:[#allocation2 + $0x30] ss:$8 sps:$4 sm:$0xff]   ;;  %v393_v15 = vld [vmem:[#allocation2 + $0x24] ss:$8 sps:$4 sm:$0xff]  }
  0x13   :  { %v395_v16 = vld [vmem:[#allocation2 + $0x20] ss:$8 sps:$4 sm:$0xff]   ;;  %v396_v17 = vld [vmem:[#allocation2 + $0x14] ss:$8 sps:$4 sm:$0xff]   ;;  %v398_v18 = vld [vmem:[#allocation2 + $0x10] ss:$8 sps:$4 sm:$0xff]  }
  0x14   :  { %374 = vset.pattern.permute.xlu0 %v475_v8  ;;  %v399_v19 = vld [vmem:[#allocation2 + $0x4] ss:$8 sps:$4 sm:$0xff]   ;;  %v401_v20 = vld [vmem:[#allocation2] ss:$8 sps:$4 sm:$0xff]   ;;  %v402_v21 = vld [vmem:[#allocation2 + $0xf4] ss:$8 sps:$4 sm:$0xff]  }
  0x15   :  { %275 = vperm.xlu0 %374, %v29_v1   ;;  %376 = vset.pattern.permute.xlu1 %v476_v9  ;;  %v404_v22 = vld [vmem:[#allocation2 + $0xf0] ss:$8 sps:$4 sm:$0xff]   ;;  %v405_v23 = vld [vmem:[#allocation2 + $0xe4] ss:$8 sps:$4 sm:$0xff]   ;;  %v407_v24 = vld [vmem:[#allocation2 + $0xe0] ss:$8 sps:$4 sm:$0xff]  }
  0x16   :  { %236 = vmatpush1.bf16.msra.mxu0 %v383_v6  ;;  %299 = vperm.xlu1 %376, %v29_v1   ;;  %v408_v25 = vld [vmem:[#allocation2 + $0xd4] ss:$8 sps:$4 sm:$0xff]   ;;  %v410_v26 = vld [vmem:[#allocation2 + $0xd0] ss:$8 sps:$4 sm:$0xff]   ;;  %v411_v27 = vld [vmem:[#allocation2 + $0xc4] ss:$8 sps:$4 sm:$0xff]  }
  0x17   :  { %237 = vmatprep.subr.bf16.mxu0 %v384_v7  ;;  %v413_v28 = vld [vmem:[#allocation2 + $0xc0] ss:$8 sps:$4 sm:$0xff]   ;;  %v414_v29 = vld [vmem:[#allocation2 + $0xb4] ss:$8 sps:$4 sm:$0xff]   ;;  %v416_v30 = vld [vmem:[#allocation2 + $0xb0] ss:$8 sps:$4 sm:$0xff]  }
  0x18   :  { %v417_v31 = vld [vmem:[#allocation2 + $0xa4] ss:$8 sps:$4 sm:$0xff]   ;;  %v419_v32 = vld [vmem:[#allocation2 + $0xa0] ss:$8 sps:$4 sm:$0xff]   ;;  %v420_v33 = vld [vmem:[#allocation2 + $0x94] ss:$8 sps:$4 sm:$0xff]  }
  0x19   :  { %377 = vset.pattern.permute.xlu0 %v476_v9  ;;  %v422_v34 = vld [vmem:[#allocation2 + $0x90] ss:$8 sps:$4 sm:$0xff]   ;;  %v423_v35 = vld [vmem:[#allocation2 + $0x84] ss:$8 sps:$4 sm:$0xff]   ;;  %v425_v36 = vld [vmem:[#allocation2 + $0x80] ss:$8 sps:$4 sm:$0xff]  }
  0x1a   :  { %238 = vmatpush1.bf16.msra.mxu0 %v386_v10  ;;  %v28_v39 = vadd.s32 128, %v27_v38  ;;  %v477_v41 = vmov 1.0|1.0   ;;  %vm284_vm10 = vcmp.eq.s32.totalorder %v27_v38, 0  ;;  %vm296_vm11 = vcmp.eq.s32.totalorder %v27_v38, 1  ;;  %s478_s0 = smov [#allocation5]  }
  0x1b   :  { %239 = vmatprep.subr.bf16.mxu0 %v387_v11  ;;  %s317_s1 = sshll.u32 %s478_s0, 4  ;;  %vm308_vm12 = vcmp.eq.s32.totalorder %v27_v38, 2  ;;  %s318_s1 = int_to_ptr.vmem [resolvable:$true] %s317_s1 }
  0x1c   :  { %s446_s18 = scalar_lea.vmem %s318_s1, 128  ;;  %p451_p6 = scmp.lt.s32.totalorder %s318_s1, %s318_s1 }
  0x1d   :  { %p447_p5 = scmp.ne.s32.totalorder %s318_s1, %s446_s18  ;;  %p452_p7 = scmp.lt.s32.totalorder %s446_s18, %s446_s18 }
  0x1e   :  { %240 = vmatpush1.bf16.msra.mxu0 %v389_v12 }
  0x1f   :  { %241 = vmatprep.subr.bf16.mxu0 %v390_v13  ;;  %p453_p8 = por %p452_p7, %p451_p6 }
  0x21   :  { %p454_p9 = pnand %p453_p8, %p447_p5 }
  0x22   :  { %242 = vmatpush1.bf16.msra.mxu0 %v392_v14 }
  0x23   :  { %243 = vmatprep.subr.bf16.mxu0 %v393_v15 }
  0x26   :  { %244 = vmatpush1.bf16.msra.mxu0 %v395_v16 }
  0x27   :  { %245 = vmatprep.subr.bf16.mxu0 %v396_v17 }
  0x2a   :  { %246 = vmatpush1.bf16.msra.mxu0 %v398_v18 }
  0x2b   :  { %247 = vmatprep.subr.bf16.mxu0 %v399_v19 }
  0x2e   :  { %248 = vmatpush1.bf16.msra.mxu0 %v401_v20 }
  0x2f   :  { %249 = vmatprep.subr.bf16.mxu0 %v402_v21 }
  0x32   :  { %250 = vmatpush2.bf16.msra.mxu0 %v404_v22 }
  0x33   :  { %251 = vmatprep.subr.bf16.mxu0 %v405_v23 }
  0x36   :  { %252 = vmatpush2.bf16.msra.mxu0 %v407_v24 }
  0x37   :  { %253 = vmatprep.subr.bf16.mxu0 %v408_v25 }
  0x3a   :  { %254 = vmatpush2.bf16.msra.mxu0 %v410_v26 }
  0x3b   :  { %255 = vmatprep.subr.bf16.mxu0 %v411_v27 }
  0x3e   :  { %256 = vmatpush2.bf16.msra.mxu0 %v413_v28 }
  0x3f   :  { %257 = vmatprep.subr.bf16.mxu0 %v414_v29 }
  0x42   :  { %258 = vmatpush2.bf16.msra.mxu0 %v416_v30 }
  0x43   :  { %259 = vmatprep.subr.bf16.mxu0 %v417_v31 }
  0x46   :  { %260 = vmatpush2.bf16.msra.mxu0 %v419_v32 }
  0x47   :  { %261 = vmatprep.subr.bf16.mxu0 %v420_v33 }
  0x4a   :  { %262 = vmatpush2.bf16.msra.mxu0 %v422_v34 }
  0x4b   :  { %263 = vmatprep.subr.bf16.mxu0 %v423_v35 }
  0x4e   :  { %264 = vmatpush2.bf16.msra.mxu0 %v425_v36 }
  0x8b   :  { %v32_v40 = vpop.permute.xlu0 %31 }
  0x8c   :  { %vm33_vm0 = vcmp.eq.s32.totalorder %v27_v38, %v32_v40  ;;  %vm34_vm1 = vcmp.eq.s32.totalorder %v28_v39, %v32_v40  ;;  %v288_v42 = vpop.permute.xlu1 %287 }
  0x8d   :  { %vm362_vm2 = vmpackc.low %vm33_vm0, %vm33_vm0  ;;  %vm289_vm4 = vcmp.eq.s32.totalorder %v27_v38, %v288_v42  ;;  %vm290_vm5 = vcmp.eq.s32.totalorder %v28_v39, %v288_v42 }
  0x8e   :  { %vm360_vm3 = vmpackc.low %vm34_vm1, %vm34_vm1 }
  0x8f   :  { %361 = vmatprep.mubr.msk.bf16.mxu0 %vm360_vm3, %v477_v41 }
  0x90   :  { %363 = vmatmul.mubr.msk.bf16.vlgmr.msra.gmra.mxu0 %vm362_vm2, %v477_v41  ;;  %v276_v43 = vpop.permute.xlu0 %275 }
  0x91   :  { %vm277_vm6 = vcmp.eq.s32.totalorder %v27_v38, %v276_v43  ;;  %vm278_vm7 = vcmp.eq.s32.totalorder %v28_v39, %v276_v43  ;;  %v300_v45 = vpop.permute.xlu1 %299 }
  0x92   :  { %vm302_vm8 = vcmp.eq.s32.totalorder %v28_v39, %v300_v45  ;;  %vm301_vm9 = vcmp.eq.s32.totalorder %v27_v38, %v300_v45 }
 0x150   :  { %v267_v44 = vpop.f32.mrf.mxu0 }
 0x151   :  { %v291_v47 = vsel %vm289_vm4, %v267_v44, 0.0  ;;  %v279_v49 = vsel %vm277_vm6, %v267_v44, 0.0  ;;  %v303_v56 = vsel %vm301_vm9, %v267_v44, 0.0 }
 0x152   :  { %v269_v46 = vpop.f32.mrf.mxu0 }
 0x153   :  { %v292_v48 = vsel %vm290_vm5, %v269_v46, 0.0  ;;  %v280_v50 = vsel %vm278_vm7, %v269_v46, 0.0  ;;  %v304_v54 = vsel %vm302_vm8, %v269_v46, 0.0 }
 0x154   :  { %v271_v51 = vpop.f32.mrf.mxu0  ;;  %v293_v52 = vadd.f32 %v292_v48, %v291_v47  ;;  %v281_v53 = vadd.f32 %v280_v50, %v279_v49  ;;  %v305_v57 = vadd.f32 %v304_v54, %v303_v56 }
 0x156   :  { %294 = vadd.xlane.f32.xlu0 %v293_v52  ;;  %v272_v55 = vpop.f32.mrf.mxu0  ;;  %282 = vadd.xlane.f32.xlu1 %v281_v53 }
 0x15a   :  { %306 = vadd.xlane.f32.xlu0 %v305_v57 }
 0x1df   :  { %v283_v58 = vpop.xlane.xlu1 %282  ;;  %v295_v59 = vpop.xlane.xlu0 %294 }
 0x1e0   :  { %v285_v60 = vsel %vm284_vm10, %v283_v58, 0.0 }
 0x1e1   :  { %v297_v61 = vsel %vm296_vm11, %v295_v59, %v285_v60 }
 0x1e3   :  { %v307_v62 = vpop.xlane.xlu0 %306 }
 0x1e4   :  { %v309_v63 = vsel %vm308_vm12, %v307_v62, %v297_v61 }
 0x1e5   :  { %310 = vst [vmem:[#allocation5] sm:$0xff] %v309_v63 }
 0x1e6   :  { %457 = shalt.err (!%p454_p9)
}
 0x1e7   :  { %320 = dma.vmem_to_hbm [thread:$0]  %s318_s1, 128, %s505_s2, [#allocation4]  }
 0x1e8   :  { %468 = dma.done.wait [#allocation4], 128  }
 0x1e9   :  { %469 = vsyncadd [#allocation4], 4294967168 }
 0x1ea   :  { %324 = vsyncpa [#allocation3], 1 }
 0x1eb   :  { %325 = vsyncpa [#allocation4], 1 }

</bundles_post_ra>
